<compile_context>
chip_gen: v5e
topology: v5e:2x2
jax: 0.10.0
libtpu: 0.0.40
codegen_flags: <defaults>
</compile_context>

<pallas_src>
import functools

import jax
import jax.numpy as jnp
from jax import lax
from jax.experimental import pallas as pl
from jax.experimental.pallas import tpu as pltpu


# ----------------------------------------------------------------------------- kernel ----
def conv_attention_kernel(x_ref, v_ref, c_ref, out_ref, m_sc, l_sc, acc_sc,
                          *, seq_len, seq_padded, seq_tile):
    # x_ref  : (Bt, St, D)  VMEM tile of the input
    # v_ref  : (1, D)       fused attention direction  v = W^T y   (f32, VMEM)
    # c_ref  : (1,)         fused bias term            c = b . y   (f32, SMEM)
    # out_ref: (1, Bt, D)   per-batch-block output slab
    # m_sc/l_sc/acc_sc: online-softmax running max / denom / weighted-sum accumulators
    j = pl.program_id(1)

    @pl.when(j == 0)
    def _():
        m_sc[...] = jnp.full(m_sc.shape, -1e30, jnp.float32)
        l_sc[...] = jnp.zeros_like(l_sc)
        acc_sc[...] = jnp.zeros_like(acc_sc)

    x = x_ref[...]                                   # (Bt, St, D), native dtype
    c = c_ref[0]                                     # scalar from SMEM

    # scores[b,t] = tanh( x[b,t,:] . v + c )  -- exact fusion of Linear + <., y>
    scores = jnp.tanh(jnp.sum(x * v_ref[...], axis=-1).astype(jnp.float32) + c)  # (Bt, St)

    if seq_padded != seq_len:                        # static: mask zero-padded seq positions
        t = j * seq_tile + lax.broadcasted_iota(jnp.int32, scores.shape, 1)
        scores = jnp.where(t < seq_len, scores, jnp.float32(-1e30))

    # Online (numerically-stable) softmax accumulation over the sequence axis.
    m_prev = m_sc[...]                                               # (Bt, 1)
    m_new = jnp.maximum(m_prev, jnp.max(scores, axis=-1, keepdims=True))
    alpha = jnp.exp(m_prev - m_new)                                  # (Bt, 1)
    p = jnp.exp(scores - m_new)                                      # (Bt, St)
    l_sc[...] = alpha * l_sc[...] + jnp.sum(p, axis=-1, keepdims=True)

    # Partial attention-weighted sum of x on the MXU: (Bt,1,St) @ (Bt,St,D) -> (Bt,1,D)
    pv = jnp.einsum(
        "bqs,bsd->bqd",
        p[:, None, :].astype(x.dtype),
        x,
        preferred_element_type=jnp.float32,
    )[:, 0, :]                                                       # (Bt, D)
    acc_sc[...] = alpha * acc_sc[...] + pv
    m_sc[...] = m_new

    @pl.when(j == pl.num_programs(1) - 1)
    def _():
        out_ref[0] = (acc_sc[...] / l_sc[...]).astype(out_ref.dtype)


# ------------------------------------------------------------------------ tile chooser ----
def _cdiv(a, b):
    return -(-a // b)


def _vmem_limit_bytes():
    """Scoped VMEM limit to request: half the physical VMEM, capped at 64 MiB."""
    try:
        cap = int(pltpu.get_tpu_info().vmem_capacity_bytes)
    except Exception:
        cap = 64 * 1024 * 1024          # conservative fallback (= v7x per-TC VMEM)
    return min(64 * 1024 * 1024, max(16 * 1024 * 1024, cap // 2))


def _num_tensorcores():
    """2 for generations where one JAX device spans 2 TensorCores (v4/v5p megacore, v7x)."""
    try:
        kind = (jax.devices()[0].device_kind or "").lower()
    except Exception:
        return 1
    return 2 if any(tag in kind for tag in ("v7", "v5p", "v4")) else 1


def _choose_tiles(B, S, D, itemsize, vmem_limit, num_tc):
    """Byte-budgeted (Bt, St) tile choice.

    Per-step working set ~= 2 * x_tile (double buffer) + x_tile_f32 (the x*v temporary)
    + small (v, out, scratch), so each x tile gets <= vmem_limit/4, capped at 8 MiB
    (measured tiled-copy data: ~512+ rows / few-MiB tiles reach ~85%+ of HBM roofline).
    """
    tile_budget = min(8 * 1024 * 1024, max(512 * 1024, vmem_limit // 4))

    row_bytes = D * itemsize            # one (1, 1, D) slice of x
    # TODO(synk): for absurdly wide D (8*D*itemsize > tile_budget) a D-axis split would be
    # needed; not implemented (scores/output would need a second reduction axis).
    if S * row_bytes <= tile_budget:
        St = S                          # whole sequence fits one tile
    else:
        St = max(8, ((tile_budget // row_bytes) // 8) * 8)   # sublane-aligned seq tile
        St = min(St, S)
    grid_s = _cdiv(S, St)
    S_pad = grid_s * St

    bt_cap = max(1, min(B, tile_budget // max(1, St * row_bytes)))
    if num_tc > 1 and B > 1:            # keep both TensorCores busy on multi-TC chips
        bt_cap = min(bt_cap, _cdiv(B, num_tc))
    # Prefer an exact divisor of B (no padding) unless it is much smaller than the cap.
    divisors = [d for d in range(1, bt_cap + 1) if B % d == 0]
    best_div = max(divisors) if divisors else 1
    Bt = best_div if best_div * 2 >= bt_cap else bt_cap
    grid_b = _cdiv(B, Bt)
    B_pad = grid_b * Bt
    return Bt, St, grid_b, grid_s, B_pad, S_pad


# ----------------------------------------------------------------------------- wrapper ----
def conv_attention(x, W, b, y, *, batch_tile=None, seq_tile=None):
    """x: (B, S, D); W: (D, D) nn.Linear weight; b: (D,); y: (D,). Returns (B, D)."""
    B, S, D = x.shape
    itemsize = jnp.dtype(x.dtype).itemsize
    vmem_limit = _vmem_limit_bytes()
    num_tc = _num_tensorcores()

    Bt, St, grid_b, grid_s, B_pad, S_pad = _choose_tiles(
        B, S, D, itemsize, vmem_limit, num_tc)
    if batch_tile is not None:
        Bt = batch_tile
        grid_b = _cdiv(B, Bt)
        B_pad = grid_b * Bt
    if seq_tile is not None:
        St = seq_tile
        grid_s = _cdiv(S, St)
        S_pad = grid_s * St

    # Algebraic fusion of the Linear into the score (exact in real arithmetic):
    #   <x W^T + b, y> = x . (W^T y) + b . y
    v = jnp.dot(y, W).reshape(1, D).astype(jnp.float32)   # = W^T y, no transpose materialized
    c = jnp.dot(b, y).reshape(1).astype(jnp.float32)      # = b . y, scalar -> SMEM

    xp = x
    if (B_pad, S_pad) != (B, S):                          # zero-pad ragged batch / sequence
        xp = jnp.pad(x, ((0, B_pad - B), (0, S_pad - S), (0, 0)))

    kernel = functools.partial(conv_attention_kernel,
                               seq_len=S, seq_padded=S_pad, seq_tile=St)

    out = pl.pallas_call(
        kernel,
        out_shape=jax.ShapeDtypeStruct((grid_b, Bt, D), x.dtype),
        grid_spec=pltpu.PrefetchScalarGridSpec(
            num_scalar_prefetch=0,
            grid=(grid_b, grid_s),                               # batch blocks x seq blocks
            in_specs=[
                pl.BlockSpec((Bt, St, D), lambda i, j: (i, j, 0)),   # x tile
                pl.BlockSpec((1, D), lambda i, j: (0, 0)),           # fused direction v
                pl.BlockSpec(memory_space=pltpu.MemorySpace.SMEM),   # fused scalar c
            ],
            out_specs=pl.BlockSpec((1, Bt, D), lambda i, j: (i, 0, 0)),
            scratch_shapes=[
                pltpu.VMEM((Bt, 1), jnp.float32),   # running max
                pltpu.VMEM((Bt, 1), jnp.float32),   # running denom
                pltpu.VMEM((Bt, D), jnp.float32),   # running weighted sum
            ],
        ),
        compiler_params=pltpu.CompilerParams(
            dimension_semantics=("parallel", "arbitrary"),
            vmem_limit_bytes=vmem_limit,
        ),
    )(xp, v, c)

    out = out.reshape(B_pad, D)
    return out[:B] if B_pad != B else out


# --------------------------------------------------------------------------- reference ----
def conv_attention_ref(x, W, b, y):
    """Pure-JAX reference mirroring the (unfused) PyTorch forward."""
    u = jnp.einsum("btd,ed->bte", x, W) + b            # Linear: x @ W.T + b
    scores = jnp.tanh(jnp.einsum("btd,d->bt", u, y))   # batch_matmul1 with tanh
    attn = jax.nn.softmax(scores, axis=1)              # nn.Softmax over seq dim
    return jnp.einsum("bt,btd->bd", attn, x)           # attention_mul


if __name__ == "__main__":
    batch, seq_len, input_size = 2, 8, 32

    key = jax.random.PRNGKey(0)
    kx, kw, kb, ky = jax.random.split(key, 4)

    x = jax.random.normal(kx, (batch, seq_len, input_size), dtype=jnp.float32)
    # Deterministic parameter init (shapes from nn.Linear(input_size, input_size)):
    bound = 1.0 / jnp.sqrt(input_size)
    W = jax.random.uniform(kw, (input_size, input_size), minval=-bound, maxval=bound,
                           dtype=jnp.float32)
    b = jax.random.uniform(kb, (input_size,), minval=-bound, maxval=bound,
                           dtype=jnp.float32)
    # Attention vector y (the `weight` of batch_matmul1), shape [input_size].
    y = jax.random.normal(ky, (input_size,), dtype=jnp.float32)

    out = conv_attention(x, W, b, y)
    out = jax.block_until_ready(out)

    ref = conv_attention_ref(x, W, b, y)
    assert out.shape == (batch, input_size)
    assert jnp.allclose(out, ref, atol=1e-5, rtol=1e-5), (out, ref)

    print("KERNEL_OK")
</pallas_src>

<mosaic_0001>
module attributes {stable_mosaic.version = 11 : i64} {
  func.func @conv_attention_kernel(%arg0: i32, %arg1: i32, %arg2: memref<2x8x32xf32, #tpu.memory_space<vmem>>, %arg3: memref<1x32xf32, #tpu.memory_space<vmem>>, %arg4: memref<1xf32, #tpu.memory_space<smem>>, %arg5: memref<1x2x32xf32, #tpu.memory_space<vmem>>, %arg6: memref<2x1xf32, #tpu.memory_space<vmem>>, %arg7: memref<2x1xf32, #tpu.memory_space<vmem>>, %arg8: memref<2x32xf32, #tpu.memory_space<vmem>>) attributes {dimension_semantics = [#tpu.dimension_semantics<parallel>, #tpu.dimension_semantics<arbitrary>], iteration_bounds = array<i64: 1, 1>, scalar_prefetch = 0 : i64, scratch_operands = 3 : i64, tpu.core_type = #tpu.core_type<tc>, window_params = [{transform_indices = @transform_0, window_bounds = array<i64: 2, 8, 32>}, {pipeline_mode = #tpu.pipeline_mode<synchronous>, transform_indices = @transform_1, window_bounds = array<i64: 1, 32>}, {transform_indices = @transform_2, window_bounds = array<i64: 1>}, {transform_indices = @transform_3, window_bounds = array<i64: 1, 2, 32>}]} {
    %c0_i32 = arith.constant 0 : i32
    %0 = arith.cmpi eq, %arg1, %c0_i32 : i32
    %1 = arith.extui %0 : i1 to i32
    %c0_i32_0 = arith.constant 0 : i32
    %2 = arith.cmpi ne, %1, %c0_i32_0 : i32
    scf.if %2 {
      %cst_23 = arith.constant -1.000000e+30 : f32
      %40 = vector.broadcast %cst_23 : f32 to vector<2x1xf32>
      %c0_24 = arith.constant 0 : index
      %c0_25 = arith.constant 0 : index
      %41 = vector.load %arg6[%c0_24, %c0_25] : memref<2x1xf32, #tpu.memory_space<vmem>>, vector<2x1xf32>
      tpu.vector_store %arg6[%c0_24, %c0_25], %40 {strides = array<i32>} : memref<2x1xf32, #tpu.memory_space<vmem>>, vector<2x1xf32>,
      %cst_26 = arith.constant 0.000000e+00 : f32
      %42 = vector.broadcast %cst_26 : f32 to vector<2x1xf32>
      %c0_27 = arith.constant 0 : index
      %c0_28 = arith.constant 0 : index
      %43 = vector.load %arg7[%c0_27, %c0_28] : memref<2x1xf32, #tpu.memory_space<vmem>>, vector<2x1xf32>
      tpu.vector_store %arg7[%c0_27, %c0_28], %42 {strides = array<i32>} : memref<2x1xf32, #tpu.memory_space<vmem>>, vector<2x1xf32>,
      %cst_29 = arith.constant 0.000000e+00 : f32
      %44 = vector.broadcast %cst_29 : f32 to vector<2x32xf32>
      %c0_30 = arith.constant 0 : index
      %c0_31 = arith.constant 0 : index
      %45 = vector.load %arg8[%c0_30, %c0_31] : memref<2x32xf32, #tpu.memory_space<vmem>>, vector<2x32xf32>
      tpu.vector_store %arg8[%c0_30, %c0_31], %44 {strides = array<i32>} : memref<2x32xf32, #tpu.memory_space<vmem>>, vector<2x32xf32>,
    } else {
    }
    %c0 = arith.constant 0 : index
    %c0_1 = arith.constant 0 : index
    %c0_2 = arith.constant 0 : index
    %3 = vector.load %arg2[%c0, %c0_1, %c0_2] : memref<2x8x32xf32, #tpu.memory_space<vmem>>, vector<2x8x32xf32>
    %c0_3 = arith.constant 0 : index
    %4 = memref.load %arg4[%c0_3] : memref<1xf32, #tpu.memory_space<smem>>
    %c0_4 = arith.constant 0 : index
    %c0_5 = arith.constant 0 : index
    %5 = vector.load %arg3[%c0_4, %c0_5] : memref<1x32xf32, #tpu.memory_space<vmem>>, vector<1x32xf32>
    %6 = vector.shape_cast %5 : vector<1x32xf32> to vector<1x1x32xf32>
    %7 = vector.broadcast %6 : vector<1x1x32xf32> to vector<2x8x32xf32>
    %8 = arith.mulf %3, %7 : vector<2x8x32xf32>
    %cst = arith.constant dense<0.000000e+00> : vector<2x8xf32>
    %9 = vector.multi_reduction <add>, %8, %cst [2] : vector<2x8x32xf32> to vector<2x8xf32>
    %10 = vector.broadcast %4 : f32 to vector<2x8xf32>
    %11 = arith.addf %9, %10 : vector<2x8xf32>
    %12 = math.tanh %11 : vector<2x8xf32>
    %c0_6 = arith.constant 0 : index
    %c0_7 = arith.constant 0 : index
    %13 = vector.load %arg6[%c0_6, %c0_7] : memref<2x1xf32, #tpu.memory_space<vmem>>, vector<2x1xf32>
    %cst_8 = arith.constant dense<0xFF800000> : vector<2xf32>
    %14 = vector.multi_reduction <maximumf>, %12, %cst_8 [1] : vector<2x8xf32> to vector<2xf32>
    %15 = vector.shape_cast %14 : vector<2xf32> to vector<2x1xf32>
    %16 = arith.maximumf %13, %15 : vector<2x1xf32>
    %17 = arith.subf %13, %16 : vector<2x1xf32>
    %18 = math.exp %17 : vector<2x1xf32>
    %19 = vector.broadcast %16 : vector<2x1xf32> to vector<2x8xf32>
    %20 = arith.subf %12, %19 : vector<2x8xf32>
    %21 = math.exp %20 : vector<2x8xf32>
    %c0_9 = arith.constant 0 : index
    %c0_10 = arith.constant 0 : index
    %22 = vector.load %arg7[%c0_9, %c0_10] : memref<2x1xf32, #tpu.memory_space<vmem>>, vector<2x1xf32>
    %23 = arith.mulf %18, %22 : vector<2x1xf32>
    %cst_11 = arith.constant dense<0.000000e+00> : vector<2xf32>
    %24 = vector.multi_reduction <add>, %21, %cst_11 [1] : vector<2x8xf32> to vector<2xf32>
    %25 = vector.shape_cast %24 : vector<2xf32> to vector<2x1xf32>
    %26 = arith.addf %23, %25 : vector<2x1xf32>
    %c0_12 = arith.constant 0 : index
    %c0_13 = arith.constant 0 : index
    %27 = vector.load %arg7[%c0_12, %c0_13] : memref<2x1xf32, #tpu.memory_space<vmem>>, vector<2x1xf32>
    tpu.vector_store %arg7[%c0_12, %c0_13], %26 {strides = array<i32>} : memref<2x1xf32, #tpu.memory_space<vmem>>, vector<2x1xf32>,
    %28 = vector.shape_cast %21 : vector<2x8xf32> to vector<2x1x8xf32>
    "tpu.trace_start"() <{level = 10 : i32, message = "bqs,bsd->bqd"}> : () -> ()
    %cst_14 = arith.constant dense<0.000000e+00> : vector<2x1x32xf32>
    %29 = tpu.matmul %28, %3, %cst_14 {dimension_numbers = #tpu.dot_dimension_numbers<[2], [1], [1], [2], [0, 0, 0, 1, 1, 2], [0], [0]>} : vector<2x1x8xf32>, vector<2x8x32xf32>, vector<2x1x32xf32> -> vector<2x1x32xf32>
    "tpu.trace_stop"() : () -> ()
    %30 = vector.shape_cast %29 : vector<2x1x32xf32> to vector<2x32xf32>
    %c0_15 = arith.constant 0 : index
    %c0_16 = arith.constant 0 : index
    %31 = vector.load %arg8[%c0_15, %c0_16] : memref<2x32xf32, #tpu.memory_space<vmem>>, vector<2x32xf32>
    %32 = vector.broadcast %18 : vector<2x1xf32> to vector<2x32xf32>
    %33 = arith.mulf %32, %31 : vector<2x32xf32>
    %34 = arith.addf %33, %30 : vector<2x32xf32>
    %c0_17 = arith.constant 0 : index
    %c0_18 = arith.constant 0 : index
    %35 = vector.load %arg8[%c0_17, %c0_18] : memref<2x32xf32, #tpu.memory_space<vmem>>, vector<2x32xf32>
    tpu.vector_store %arg8[%c0_17, %c0_18], %34 {strides = array<i32>} : memref<2x32xf32, #tpu.memory_space<vmem>>, vector<2x32xf32>,
    %c0_19 = arith.constant 0 : index
    %c0_20 = arith.constant 0 : index
    %36 = vector.load %arg6[%c0_19, %c0_20] : memref<2x1xf32, #tpu.memory_space<vmem>>, vector<2x1xf32>
    tpu.vector_store %arg6[%c0_19, %c0_20], %16 {strides = array<i32>} : memref<2x1xf32, #tpu.memory_space<vmem>>, vector<2x1xf32>,
    %c0_i32_21 = arith.constant 0 : i32
    %37 = arith.cmpi eq, %arg1, %c0_i32_21 : i32
    %38 = arith.extui %37 : i1 to i32
    %c0_i32_22 = arith.constant 0 : i32
    %39 = arith.cmpi ne, %38, %c0_i32_22 : i32
    scf.if %39 {
      %c0_23 = arith.constant 0 : index
      %c0_24 = arith.constant 0 : index
      %40 = vector.load %arg8[%c0_23, %c0_24] : memref<2x32xf32, #tpu.memory_space<vmem>>, vector<2x32xf32>
      %c0_25 = arith.constant 0 : index
      %c0_26 = arith.constant 0 : index
      %41 = vector.load %arg7[%c0_25, %c0_26] : memref<2x1xf32, #tpu.memory_space<vmem>>, vector<2x1xf32>
      %42 = vector.broadcast %41 : vector<2x1xf32> to vector<2x32xf32>
      %43 = arith.divf %40, %42 : vector<2x32xf32>
      %c0_27 = arith.constant 0 : index
      %c0_28 = arith.constant 0 : index
      %c0_29 = arith.constant 0 : index
      %44 = vector.load %arg5[%c0_27, %c0_28, %c0_29] : memref<1x2x32xf32, #tpu.memory_space<vmem>>, vector<1x2x32xf32>
      %45 = vector.shape_cast %44 : vector<1x2x32xf32> to vector<2x32xf32>
      %46 = vector.shape_cast %43 : vector<2x32xf32> to vector<1x2x32xf32>
      tpu.vector_store %arg5[%c0_27, %c0_28, %c0_29], %46 {strides = array<i32>} : memref<1x2x32xf32, #tpu.memory_space<vmem>>, vector<1x2x32xf32>,
    } else {
    }
    return
  }
  func.func @transform_0(%arg0: i32, %arg1: i32) -> (i32, i32, i32) {
    %c0_i32 = arith.constant 0 : i32
    %c0_i32_0 = arith.constant 0 : i32
    return %arg0, %arg1, %c0_i32 : i32, i32, i32
  }
  func.func @transform_1(%arg0: i32, %arg1: i32) -> (i32, i32) {
    %c0_i32 = arith.constant 0 : i32
    %c0_i32_0 = arith.constant 0 : i32
    %c0_i32_1 = arith.constant 0 : i32
    return %c0_i32, %c0_i32_0 : i32, i32
  }
  func.func @transform_2(%arg0: i32, %arg1: i32) -> i32 {
    %c0_i32 = arith.constant 0 : i32
    %c0_i32_0 = arith.constant 0 : i32
    return %c0_i32 : i32
  }
  func.func @transform_3(%arg0: i32, %arg1: i32) -> (i32, i32, i32) {
    %c0_i32 = arith.constant 0 : i32
    %c0_i32_0 = arith.constant 0 : i32
    %c0_i32_1 = arith.constant 0 : i32
    return %arg0, %c0_i32, %c0_i32_0 : i32, i32, i32
  }
}

</mosaic_0001>

<bundles_post_ra>
// kernel: tpu_custom_call.1
= control target key start
LH: loop header
LB: loop body
LE: loop exit
PB: predicated region body
PF: predicated region fallthrough
CT: control target
= control target key end

     0   :  { %9 = vsyncpa [#allocation7], 0  ;;  %s346_s0 = inlined_call_operand.hbm [shape: f32[2,8,32], index: 0, kind: input, shape index: {}]   ;;  %s347_s1 = inlined_call_operand.vmem [shape: f32[1,32], index: 1, kind: input, shape index: {}]   ;;  %s348_s2 = inlined_call_operand.<no memory space> [shape: f32[1], index: 2, kind: input, shape index: {}]   ;;  %s349_s3 = inlined_call_operand.hbm [shape: f32[1,2,32], index: 3, kind: output, shape index: {}]  }
   0x1   :  { %10 = vsyncpa [#allocation8], 0  ;;  %s15_s14 = sshll.u32 %s346_s0, 4  ;;  %s295_s15 = smov [#allocation6]   ;;  %s16_s14 = int_to_ptr.hbm [resolvable:$true] %s15_s14 }
   0x2   :  { %s17_s16 = sshll.u32 %s295_s15, 4  ;;  %s296_s17 = smov 128   ;;  %s18_s16 = int_to_ptr.vmem [resolvable:$true] %s17_s16 }
   0x3   :  { %s297_s18 = smov 8  }
   0x4   :  { %23 = dma.hbm_to_vmem [thread:$0]  %s16_s14, 256, %s18_s16, [#allocation7], %s296_s17, %s296_s17, %s297_s18  }
   0x5   :  { %291 = dma.done.wait [#allocation7], 256  }
   0x6   :  { %292 = vsyncadd [#allocation7], 4294967040  ;;  %v41_v0 = vld [vmem:[#allocation6] sm:$0xff]  ;;  %v230_v1 = vld [vmem:[%s347_s1] ss:$0 sm:$0xff]  ;;  %vm50_vm0 = vcmask 261120   ;;  %v57_v9 = vstv %s348_s2  ;;  %v65_v13 = vlaneseq }
   0x7   :  { %v42_v2 = vld [vmem:[#allocation6 + $0x8] sm:$0xff]  ;;  %132 = vmatpush.msra.mxu0 %v41_v0  ;;  %v48_v3 = vmul.f32 %v230_v1, %v41_v0  ;;  %vm36_vm1 = vcmask 1024   ;;  %v298_v7 = vmov -1e+30   ;;  %vm69_vm2 = vcmask 1041409   ;;  %s301_s1 = smov [#allocation9]  }
   0x8   :  { %154 = vmatpush.msra.mxu1 %v42_v2  ;;  %v49_v5 = vmul.f32 %v230_v1, %v42_v2  ;;  %37 = vst.msk [vmem:[#allocation2] sm:$0x3] %vm36_vm1, %v298_v7  ;;  %v66_v14 = vand.u32 127, %v65_v13  ;;  %vm72_vm3 = vcmask 58368   ;;  %v299_v21 = vmov 0   ;;  %s206_s2 = sshll.u32 %s301_s1, 4  ;;  %s207_s2 = int_to_ptr.vmem [resolvable:$true] %s206_s2 }
   0x9   :  { %v51_v4 = vsel %vm50_vm0, %v48_v3, 0.0  ;;  %227 = vset.pattern.permute.xlu1 %v299_v21  ;;  %228 = vset.pattern.permute.xlu2 %v299_v21  ;;  %v300_v22 = vmov 0.0   ;;  %vm114_vm4 = vcmask 64512   ;;  %vm39_vm5 = vcmask 254976   ;;  %s208_s24 = sshll.u32 %s349_s3, 4  ;;  %s209_s24 = int_to_ptr.hbm [resolvable:$true] %s208_s24 }
   0xa   :  { %52 = vadd.xlane.f32.xlu0 %v51_v4  ;;  %v54_v6 = vsel %vm50_vm0, %v49_v5, 0.0  ;;  %38 = vst.msk [vmem:[#allocation3] sm:$0x3] %vm36_vm1, %v300_v22 }
   0xb   :  { %229 = vset.pattern.permute.xlu0 %v299_v21  ;;  %40 = vst.msk [vmem:[#allocation4] sm:$0x3] %vm39_vm5, %v300_v22 }
   0xf   :  { %v62_v23 = vld [vmem:[#allocation2] sm:$0x3] }
  0x11   :  { %v94_v44 = vld [vmem:[#allocation3] sm:$0x3] }
  0x12   :  { %55 = vadd.xlane.f32.xlu0 %v54_v6  ;;  %v159_v50 = vld [vmem:[#allocation4] sm:$0x3] }
  0x7d   :  { %v53_v8 = vpop.xlane.xlu0 %52 }
  0x7e   :  { %v58_v10 = vadd.f32 %v57_v9, %v53_v8 }
  0x80   :  { %231 = vtanh.f32 %v58_v10 }
  0x85   :  { %v56_v11 = vpop.xlane.xlu0 %55 }
  0x86   :  { %v59_v12 = vadd.f32 %v57_v9, %v56_v11  ;;  %v232_v15 = vpop.eup %231 }
  0x87   :  { %v67_v17 = vperm.slane %v232_v15, %v66_v14 }
  0x88   :  { %233 = vtanh.f32 %v59_v12 }
  0x8e   :  { %v234_v16 = vpop.eup %233 }
  0x8f   :  { %v68_v18 = vperm.slane %v234_v16, %v66_v14 }
  0x91   :  { %v70_v19 = vsel %vm69_vm2, %v68_v18, %v67_v17 }
  0x92   :  { %v73_v20 = vsel %vm72_vm3, %v70_v19, -inf }
  0x93   :  { %74 = vmax.xlane.f32.xlu1 %v73_v20 }
 0x106   :  { %v75_v24 = vpop.xlane.xlu1 %74 }
 0x107   :  { %v76_v25 = vmax.f32 %v62_v23, %v75_v24 }
 0x109   :  { %v77_v26 = vsub.f32 %v62_v23, %v76_v25  ;;  %174 = vst.msk [vmem:[#allocation2] sm:$0x3] %vm36_vm1, %v76_v25  ;;  %82 = vperm.xlu1 %227, %v76_v25  }
 0x10b   :  { %v78_v42 = vmul.f32 1.442695, %v77_v26 }
 0x17b   :  { %v83_v27 = vpop.permute.xlu1 %82 }
 0x17c   :  { %v85_v28 = vperm.slane %v83_v27, 1  ;;  %v84_v30 = vperm.slane %v83_v27, 0 }
 0x17e   :  { %v89_v29 = vsub.f32 %v234_v16, %v85_v28  ;;  %v88_v32 = vsub.f32 %v232_v15, %v84_v30 }
 0x180   :  { %v92_v31 = vmul.f32 1.442695, %v89_v29  ;;  %v90_v33 = vmul.f32 1.442695, %v88_v32 }
 0x182   :  { %235 = vpow2.f32 %v92_v31 }
 0x183   :  { %237 = vpow2.f32 %v90_v33 }
 0x184   :  { %239 = vpow2.f32 %v78_v42 }
 0x188   :  { %v236_v34 = vpop.eup %235 }
 0x189   :  { %102 = vperm.xlu2 %228, %v236_v34   ;;  %v238_v35 = vpop.eup %237 }
 0x18a   :  { %v240_v43 = vpop.eup %239 }
 0x18b   :  { %v95_v45 = vmul.f32 %v240_v43, %v94_v44 }
 0x191   :  { %99 = vperm.xlu2 %228, %v238_v35  }
 0x1e3   :  { %v103_v36 = vpop.permute.xlu2 %102 }
 0x1e4   :  { %v105_v37 = vperm.slane %v103_v36, %v66_v14 }
 0x1e6   :  { %219 = vmatmul.msk.f32.vlgmr.msra.gmra.mxu1 %vm114_vm4, %v105_v37 }
 0x1eb   :  { %v100_v38 = vpop.permute.xlu2 %99 }
 0x1ec   :  { %v104_v39 = vperm.slane %v100_v38, %v66_v14 }
 0x1ee   :  { %218 = vmatmul.msk.f32.vlgmr.msra.gmra.mxu0 %vm114_vm4, %v104_v39  ;;  %v106_v40 = vsel %vm69_vm2, %v105_v37, %v104_v39 }
 0x1ef   :  { %v108_v41 = vsel %vm72_vm3, %v106_v40, 0.0 }
 0x1f0   :  { %109 = vadd.xlane.f32.xlu0 %v108_v41 }
 0x204   :  { %162 = vperm.xlu0 %229, %v240_v43  }
 0x263   :  { %v110_v46 = vpop.xlane.xlu0 %109  ;;  %v156_v49 = vpop.f32.mrf.mxu1 }
 0x264   :  { %v111_v47 = vadd.f32 %v110_v46, %v95_v45  ;;  %v168_v52 = vrot.slane %v156_v49, 7 }
 0x266   :  { %113 = vst.msk [vmem:[#allocation3] sm:$0x3] %vm36_vm1, %v111_v47 }
 0x26b   :  { %v134_v51 = vpop.f32.mrf.mxu0 }
 0x26c   :  { %v169_v55 = vsel %vm69_vm2, %v168_v52, %v134_v51 }
 0x26d   :  { %v179_v48 = vld [vmem:[#allocation3] sm:$0x3] }
 0x26e   :  { %182 = vperm.xlu2 %228, %v179_v48  }
 0x276   :  { %v163_v53 = vpop.permute.xlu0 %162 }
 0x277   :  { %v165_v54 = vmul.f32 %v163_v53, %v159_v50 }
 0x279   :  { %v171_v56 = vadd.f32 %v169_v55, %v165_v54 }
 0x27b   :  { %173 = vst.msk [vmem:[#allocation4] sm:$0x3] %vm39_vm5, %v171_v56 }
 0x282   :  { %v178_v4 = vld [vmem:[#allocation4] sm:$0x3] }
 0x2c8   :  { %v183_v57 = vpop.permute.xlu2 %182 }
 0x2c9   :  { %241 = vrcp.f32 %v183_v57  ;;  %v196_v61 = vand.u32 2147483648, %v183_v57  ;;  %v194_v63 = vand.u32 2147483647, %v183_v57  ;;  %vm190_vm7 = vweird.f32 %v183_v57 }
 0x2cb   :  { %v197_v1 = vor.u32 1.1754944e-38, %v196_v61  ;;  %vm195_vm9 = vcmp.eq.f32.partialorder %v194_v63, 8.507059e+37 }
 0x2cf   :  { %v242_v58 = vpop.eup %241 }
 0x2d0   :  { %v186_v59 = vmul.f32 %v242_v58, %v183_v57  ;;  %vm191_vm6 = vweird.f32 %v242_v58 }
 0x2d1   :  { %vm192_vm8 = vmor %vm190_vm7, %vm191_vm6 }
 0x2d2   :  { %v187_v60 = vsub.f32 1.0, %v186_v59 }
 0x2d4   :  { %v188_v62 = vmul.f32 %v242_v58, %v187_v60 }
 0x2d6   :  { %v189_v0 = vadd.f32 %v242_v58, %v188_v62 }
 0x2d8   :  { %v193_v2 = vsel %vm192_vm8, %v242_v58, %v189_v0 }
 0x2d9   :  { %v198_v3 = vsel %vm195_vm9, %v197_v1, %v193_v2 }
 0x2da   :  { %v199_v5 = vmul.f32 %v198_v3, %v178_v4 }
 0x2dc   :  { %200 = vst.msk [vmem:[#allocation9] sm:$0x3] %vm39_vm5, %v199_v5 }
 0x2dd   :  { %211 = dma.vmem_to_hbm [thread:$0]  %s207_s2, 32, %s209_s24, [#allocation8]  }
 0x2de   :  { %293 = dma.done.wait [#allocation8], 32  }
 0x2df   :  { %294 = vsyncadd [#allocation8], 4294967264 }
 0x2e0   :  { %216 = vsyncpa [#allocation7], 1 }
 0x2e1   :  { %217 = vsyncpa [#allocation8], 1 }

</bundles_post_ra>
